<compile_context>
chip_gen: v5e
topology: v5e:2x2
jax: 0.10.0
libtpu: 0.0.40
codegen_flags: <defaults>
</compile_context>

<pallas_src>
import functools

import jax
import jax.numpy as jnp
from jax.experimental import pallas as pl
from jax.experimental.pallas import tpu as pltpu


def _ipd_kernel(zi_ref, zt_ref, out_ref, *, resident):
    # zi_ref:  (tm, D)                        -- row block of z
    # zt_ref:  (grid_j, D, tn) if resident, else (1, D, tn)
    # out_ref: (tm, tn)
    j = pl.program_id(1) if resident else 0
    zt_cols = zt_ref[j]                                    # (D, tn), lane-dense
    s = jnp.dot(zi_ref[...], zt_cols, preferred_element_type=jnp.float32)
    # Single-EUP sigmoid: sigmoid(x) = 0.5 * tanh(0.5 * x) + 0.5.
    out_ref[...] = (0.5 * jnp.tanh(0.5 * s) + 0.5).astype(out_ref.dtype)


def _round_up(x, m):
    return ((x + m - 1) // m) * m


def _is_pow2(x):
    return x > 0 and (x & (x - 1)) == 0


@functools.partial(jax.jit, static_argnames=("tm", "tn", "out_dtype"))
def inner_product_decoder(z, *, tm=512, tn=2048, out_dtype=jnp.bfloat16):
    """A_pred = sigmoid(z @ z.T).  z: [N, D] float32 (any N, any D)."""
    N, D = z.shape
    out_dtype = jnp.dtype(z.dtype if out_dtype is None else out_dtype)
    in_itemsize = jnp.dtype(z.dtype).itemsize
    out_itemsize = out_dtype.itemsize

    assert _is_pow2(tm) and _is_pow2(tn), "tm/tn must be powers of two"

    # Dtype-aware min tile: (8,128) f32, (16,128) bf16/f16, (32,128) 8-bit.
    sublane_min = {4: 8, 2: 16, 1: 32}.get(out_itemsize, 8)
    tm_eff = max(sublane_min, min(tm, pl.next_power_of_2(N)))
    tn_eff = max(128, min(tn, pl.next_power_of_2(N)))

    # Pad N so both (power-of-two) tile sizes divide it; padded rows are zeros
    # and the padded output band (sigmoid(0)=0.5) is sliced away before return.
    n_pad = _round_up(N, max(tm_eff, tn_eff))
    z_p = z if n_pad == N else jnp.pad(z, ((0, n_pad - N), (0, 0)))

    grid = (n_pad // tm_eff, n_pad // tn_eff)

    # Pre-transposed, pre-blocked column operand: zt_blocks[j] has shape
    # (D, tn_eff) = z[j*tn:(j+1)*tn, :].T.  One cheap XLA transpose on tiny z.
    zt_blocks = z_p.reshape(grid[1], tn_eff, D).transpose(0, 2, 1)

    # Keep the whole blocked column operand VMEM-resident when small (the
    # normal VGAE case): constant block index => it is DMA'd from HBM once.
    zt_full_bytes = n_pad * D * in_itemsize
    resident = 2 * zt_full_bytes <= (8 << 20)

    if resident:
        zt_spec = pl.BlockSpec((grid[1], D, tn_eff), lambda i, j: (0, 0, 0))
        zt_vmem_bytes = zt_full_bytes
        read_bytes = 2 * n_pad * D * in_itemsize              # zi 1 pass + zt once
    else:
        zt_spec = pl.BlockSpec((1, D, tn_eff), lambda i, j: (j, 0, 0))
        zt_vmem_bytes = D * tn_eff * in_itemsize
        read_bytes = (grid[0] + 1) * n_pad * D * in_itemsize  # zt re-streamed/row sweep

    out_tile_bytes = tm_eff * tn_eff * out_itemsize
    zi_tile_bytes = tm_eff * D * in_itemsize
    # Double-buffered tiles + slack; set the scoped VMEM limit explicitly so the
    # larger tiles / resident operand are safe on v5e's 16 MiB default too.
    vmem_est = 2 * (out_tile_bytes + zi_tile_bytes + zt_vmem_bytes) + (1 << 20)
    vmem_limit = int(max(vmem_est, 32 << 20))

    cost = pl.CostEstimate(
        flops=2 * n_pad * n_pad * D + 3 * n_pad * n_pad,
        transcendentals=n_pad * n_pad,                          # one tanh / element
        bytes_accessed=n_pad * n_pad * out_itemsize + read_bytes,
    )

    a_pred = pl.pallas_call(
        functools.partial(_ipd_kernel, resident=resident),
        out_shape=jax.ShapeDtypeStruct((n_pad, n_pad), out_dtype),
        grid_spec=pltpu.PrefetchScalarGridSpec(
            num_scalar_prefetch=0,
            grid=grid,
            in_specs=[
                pl.BlockSpec((tm_eff, D), lambda i, j: (i, 0)),  # row block of z
                zt_spec,                                         # blocked z.T columns
            ],
            out_specs=pl.BlockSpec((tm_eff, tn_eff), lambda i, j: (i, j)),
        ),
        compiler_params=pltpu.CompilerParams(
            dimension_semantics=("parallel", "parallel"),
            vmem_limit_bytes=vmem_limit,
        ),
        cost_estimate=cost,
    )(z_p, zt_blocks)

    if n_pad != N:
        a_pred = a_pred[:N, :N]
    return a_pred


def inner_product_decoder_ref(z):
    # Pure-JAX reference for correctness checking.
    return jax.nn.sigmoid(z @ z.T)


if __name__ == "__main__":
    key = jax.random.PRNGKey(0)

    # Small deterministic input consistent with the module: N nodes, D latent dims.
    # dropout=0.0 in the module => identity, so no mask is applied.
    N, D = 128, 32
    z = jax.random.normal(key, (N, D), dtype=jnp.float32)
    ref = inner_product_decoder_ref(z)

    # Default path: bf16 output (perf-review default for the store-bound kernel).
    a_bf16 = jax.block_until_ready(inner_product_decoder(z))
    assert a_bf16.shape == (N, N) and a_bf16.dtype == jnp.bfloat16
    assert jnp.allclose(a_bf16.astype(jnp.float32), ref, atol=1e-2, rtol=1e-2)

    # Full-precision path (matches the PyTorch module's f32 output dtype).
    a_f32 = jax.block_until_ready(inner_product_decoder(z, out_dtype=jnp.float32))
    assert a_f32.dtype == jnp.float32
    assert jnp.allclose(a_f32, ref, atol=1e-4, rtol=1e-4)

    # Ragged N (exercises padding + tile clamping).
    N2 = 200
    z2 = jax.random.normal(jax.random.PRNGKey(1), (N2, D), dtype=jnp.float32)
    a2 = jax.block_until_ready(inner_product_decoder(z2, out_dtype=jnp.float32))
    assert a2.shape == (N2, N2)
    assert jnp.allclose(a2, inner_product_decoder_ref(z2), atol=1e-4, rtol=1e-4)

    # Multi-tile grid (exercises the resident column-block dynamic index, j > 0).
    N3, D3 = 320, 16
    z3 = jax.random.normal(jax.random.PRNGKey(2), (N3, D3), dtype=jnp.float32)
    a3 = jax.block_until_ready(inner_product_decoder(z3, tm=128, tn=128))
    assert a3.shape == (N3, N3) and a3.dtype == jnp.bfloat16
    assert jnp.allclose(a3.astype(jnp.float32), inner_product_decoder_ref(z3),
                        atol=1e-2, rtol=1e-2)

    print("KERNEL_OK")
</pallas_src>

<mosaic_0001>
module attributes {stable_mosaic.version = 11 : i64} {
  func.func @_ipd_kernel(%arg0: i32, %arg1: i32, %arg2: memref<128x32xf32, #tpu.memory_space<vmem>>, %arg3: memref<1x32x128xf32, #tpu.memory_space<vmem>>, %arg4: memref<128x128xbf16, #tpu.memory_space<vmem>>) attributes {dimension_semantics = [#tpu.dimension_semantics<parallel>, #tpu.dimension_semantics<parallel>], iteration_bounds = array<i64: 1, 1>, scalar_prefetch = 0 : i64, scratch_operands = 0 : i64, tpu.core_type = #tpu.core_type<tc>, window_params = [{transform_indices = @transform_0, window_bounds = array<i64: 128, 32>}, {pipeline_mode = #tpu.pipeline_mode<synchronous>, transform_indices = @transform_1, window_bounds = array<i64: 1, 32, 128>}, {transform_indices = @transform_2, window_bounds = array<i64: 128, 128>}]} {
    %0 = arith.index_cast %arg1 : i32 to index
    %c0 = arith.constant 0 : index
    %c0_0 = arith.constant 0 : index
    %1 = vector.load %arg3[%0, %c0, %c0_0] : memref<1x32x128xf32, #tpu.memory_space<vmem>>, vector<1x32x128xf32>
    %2 = vector.shape_cast %1 : vector<1x32x128xf32> to vector<32x128xf32>
    %c0_1 = arith.constant 0 : index
    %c0_2 = arith.constant 0 : index
    %3 = vector.load %arg2[%c0_1, %c0_2] : memref<128x32xf32, #tpu.memory_space<vmem>>, vector<128x32xf32>
    %cst = arith.constant dense<0.000000e+00> : vector<128x128xf32>
    %4 = tpu.matmul %3, %2, %cst {dimension_numbers = #tpu.dot_dimension_numbers<[1], [0], [0], [1], [0, 0, 1, 1], [], []>} : vector<128x32xf32>, vector<32x128xf32>, vector<128x128xf32> -> vector<128x128xf32>
    %cst_3 = arith.constant 5.000000e-01 : f32
    %5 = vector.broadcast %cst_3 : f32 to vector<128x128xf32>
    %6 = arith.mulf %5, %4 : vector<128x128xf32>
    %7 = math.tanh %6 : vector<128x128xf32>
    %cst_4 = arith.constant 5.000000e-01 : f32
    %8 = vector.broadcast %cst_4 : f32 to vector<128x128xf32>
    %9 = arith.mulf %8, %7 : vector<128x128xf32>
    %cst_5 = arith.constant 5.000000e-01 : f32
    %10 = vector.broadcast %cst_5 : f32 to vector<128x128xf32>
    %11 = arith.addf %9, %10 : vector<128x128xf32>
    %12 = arith.truncf %11 : vector<128x128xf32> to vector<128x128xbf16>
    %c0_6 = arith.constant 0 : index
    %c0_7 = arith.constant 0 : index
    %13 = vector.load %arg4[%c0_6, %c0_7] : memref<128x128xbf16, #tpu.memory_space<vmem>>, vector<128x128xbf16>
    tpu.vector_store %arg4[%c0_6, %c0_7], %12 {strides = array<i32>} : memref<128x128xbf16, #tpu.memory_space<vmem>>, vector<128x128xbf16>,
    return
  }
  func.func @transform_0(%arg0: i32, %arg1: i32) -> (i32, i32) {
    %c0_i32 = arith.constant 0 : i32
    %c0_i32_0 = arith.constant 0 : i32
    return %arg0, %c0_i32 : i32, i32
  }
  func.func @transform_1(%arg0: i32, %arg1: i32) -> (i32, i32, i32) {
    %c0_i32 = arith.constant 0 : i32
    %c0_i32_0 = arith.constant 0 : i32
    %c0_i32_1 = arith.constant 0 : i32
    %c0_i32_2 = arith.constant 0 : i32
    return %c0_i32, %c0_i32_0, %c0_i32_1 : i32, i32, i32
  }
  func.func @transform_2(%arg0: i32, %arg1: i32) -> (i32, i32) {
    %c0_i32 = arith.constant 0 : i32
    return %arg0, %arg1 : i32, i32
  }
}

</mosaic_0001>

<bundles_post_ra>
// kernel: inner_product_decoder.1
= control target key start
LH: loop header
LB: loop body
LE: loop exit
PB: predicated region body
PF: predicated region fallthrough
CT: control target
= control target key end

     0   :  { %vm34_vm0 = vcmask 261120   ;;  %s495_s0 = inlined_call_operand.vmem [shape: f32[128,32], index: 0, kind: input, shape index: {}]   ;;  %s496_s1 = inlined_call_operand.vmem [shape: f32[1,32,128], index: 1, kind: input, shape index: {}]   ;;  %s497_s2 = inlined_call_operand.hbm [shape: bf16[128,128], index: 2, kind: output, shape index: {}]  }
   0x1   :  { %v17_v0 = vld [vmem:[%s496_s1 + $0x18] sm:$0xff]  ;;  %v16_v1 = vld [vmem:[%s496_s1 + $0x10] sm:$0xff]  ;;  %v15_v2 = vld [vmem:[%s496_s1 + $0x8] sm:$0xff] }
   0x2   :  { %95 = vmatpush.msra.mxu0 %v17_v0  ;;  %325 = vmatpush.msra.mxu1 %v17_v0  ;;  %v14_v3 = vld [vmem:[%s496_s1] sm:$0xff] }
   0x3   :  { %326 = vmatpush.msra.mxu2 %v17_v0  ;;  %327 = vmatpush.msra.mxu3 %v17_v0  ;;  %v18_v4 = vld [vmem:[%s495_s0] sm:$0xff] }
   0x4   :  { %96 = vmatpush.msra.mxu0 %v16_v1  ;;  %328 = vmatpush.msra.mxu1 %v16_v1  ;;  %v22_v5 = vld [vmem:[%s495_s0 + $0x20] sm:$0xff] }
   0x5   :  { %329 = vmatpush.msra.mxu2 %v16_v1  ;;  %330 = vmatpush.msra.mxu3 %v16_v1 }
   0x6   :  { %97 = vmatpush.msra.mxu0 %v15_v2  ;;  %331 = vmatpush.msra.mxu1 %v15_v2 }
   0x7   :  { %332 = vmatpush.msra.mxu2 %v15_v2  ;;  %333 = vmatpush.msra.mxu3 %v15_v2 }
   0x8   :  { %7 = vsyncpa [#allocation3], 0  ;;  %98 = vmatpush.msra.mxu0 %v14_v3  ;;  %334 = vmatpush.msra.mxu1 %v14_v3  ;;  %v26_v6 = vld [vmem:[%s495_s0 + $0x40] sm:$0xff]  ;;  %v19_v8 = vld [vmem:[%s495_s0 + $0x8] sm:$0xff]  ;;  %s250_s1 = sshll.u32 %s497_s2, 4  ;;  %s399_s23 = smov 64   ;;  %s251_s1 = int_to_ptr.hbm [resolvable:$true] %s250_s1 }
   0x9   :  { %v30_v7 = vld [vmem:[%s495_s0 + $0x60] sm:$0xff]  ;;  %335 = vmatpush.msra.mxu2 %v14_v3  ;;  %336 = vmatpush.msra.mxu3 %v14_v3  ;;  %v23_v9 = vld [vmem:[%s495_s0 + $0x28] sm:$0xff]  ;;  %v20_v12 = vld [vmem:[%s495_s0 + $0x10] sm:$0xff]  ;;  %s400_s24 = smov 4  }
   0xa   :  { %262 = vmatmul.msk.f32.vlgmr.msra.gmra.mxu0 %vm34_vm0, %v18_v4  ;;  %266 = vmatmul.msk.f32.vlgmr.msra.gmra.mxu1 %vm34_vm0, %v22_v5  ;;  %v27_v10 = vld [vmem:[%s495_s0 + $0x48] sm:$0xff]  ;;  %v24_v13 = vld [vmem:[%s495_s0 + $0x30] sm:$0xff]  ;;  %v21_v16 = vld [vmem:[%s495_s0 + $0x18] sm:$0xff] }
   0xb   :  { %270 = vmatmul.msk.f32.vlgmr.msra.gmra.mxu2 %vm34_vm0, %v26_v6  ;;  %274 = vmatmul.msk.f32.vlgmr.msra.gmra.mxu3 %vm34_vm0, %v30_v7  ;;  %v31_v11 = vld [vmem:[%s495_s0 + $0x68] sm:$0xff]  ;;  %v28_v14 = vld [vmem:[%s495_s0 + $0x50] sm:$0xff]  ;;  %v25_v17 = vld [vmem:[%s495_s0 + $0x38] sm:$0xff] }
   0xc   :  { %v32_v15 = vld [vmem:[%s495_s0 + $0x70] sm:$0xff]  ;;  %v29_v18 = vld [vmem:[%s495_s0 + $0x58] sm:$0xff] }
   0xd   :  { %v33_v19 = vld [vmem:[%s495_s0 + $0x78] sm:$0xff]  ;;  %s398_s0 = smov [#allocation2]  }
   0xe   :  { %s248_s20 = sshll.u32 %s398_s0, 4  ;;  %s249_s20 = int_to_ptr.vmem [resolvable:$true] %s248_s20 }
  0x12   :  { %263 = vmatmul.msk.f32.gmra.mxu0 %vm34_vm0, %v19_v8  ;;  %267 = vmatmul.msk.f32.gmra.mxu1 %vm34_vm0, %v23_v9 }
  0x13   :  { %271 = vmatmul.msk.f32.gmra.mxu2 %vm34_vm0, %v27_v10  ;;  %275 = vmatmul.msk.f32.gmra.mxu3 %vm34_vm0, %v31_v11 }
  0x1a   :  { %264 = vmatmul.msk.f32.gmra.mxu0 %vm34_vm0, %v20_v12  ;;  %268 = vmatmul.msk.f32.gmra.mxu1 %vm34_vm0, %v24_v13 }
  0x1b   :  { %272 = vmatmul.msk.f32.gmra.mxu2 %vm34_vm0, %v28_v14  ;;  %276 = vmatmul.msk.f32.gmra.mxu3 %vm34_vm0, %v32_v15 }
  0x22   :  { %265 = vmatmul.msk.f32.gmra.mxu0 %vm34_vm0, %v21_v16  ;;  %269 = vmatmul.msk.f32.gmra.mxu1 %vm34_vm0, %v25_v17 }
  0x23   :  { %273 = vmatmul.msk.f32.gmra.mxu2 %vm34_vm0, %v29_v18  ;;  %277 = vmatmul.msk.f32.gmra.mxu3 %vm34_vm0, %v33_v19 }
  0x87   :  { %v100_v20 = vpop.f32.mrf.mxu0  ;;  %v112_v21 = vpop.f32.mrf.mxu1 }
  0x88   :  { %v148_v22 = vmul.f32 0.5, %v100_v20  ;;  %v152_v23 = vmul.f32 0.5, %v112_v21 }
  0x8a   :  { %340 = vtanh.f32 %v148_v22 }
  0x8b   :  { %342 = vtanh.f32 %v152_v23 }
  0x8e   :  { %v124_v24 = vpop.f32.mrf.mxu2  ;;  %v136_v25 = vpop.f32.mrf.mxu3 }
  0x8f   :  { %v103_v26 = vpop.f32.mrf.mxu0  ;;  %v115_v27 = vpop.f32.mrf.mxu1  ;;  %v156_v30 = vmul.f32 0.5, %v124_v24  ;;  %v160_v31 = vmul.f32 0.5, %v136_v25 }
  0x90   :  { %v149_v28 = vmul.f32 0.5, %v103_v26  ;;  %v153_v29 = vmul.f32 0.5, %v115_v27  ;;  %v341_v32 = vpop.eup %340 }
  0x91   :  { %v343_v33 = vpop.eup %342  ;;  %v180_v40 = vmul.f32 0.5, %v341_v32 }
  0x92   :  { %344 = vtanh.f32 %v149_v28  ;;  %v184_v42 = vmul.f32 0.5, %v343_v33 }
  0x93   :  { %346 = vtanh.f32 %v153_v29  ;;  %v196_v49 = vadd.f32 0.5, %v180_v40 }
  0x94   :  { %348 = vtanh.f32 %v156_v30  ;;  %v200_v52 = vadd.f32 0.5, %v184_v42 }
  0x95   :  { %350 = vtanh.f32 %v160_v31 }
  0x96   :  { %v127_v34 = vpop.f32.mrf.mxu2  ;;  %v139_v35 = vpop.f32.mrf.mxu3 }
  0x97   :  { %v157_v36 = vmul.f32 0.5, %v127_v34  ;;  %v161_v37 = vmul.f32 0.5, %v139_v35  ;;  %v106_v38 = vpop.f32.mrf.mxu0  ;;  %v118_v39 = vpop.f32.mrf.mxu1 }
  0x98   :  { %v345_v41 = vpop.eup %344  ;;  %v150_v47 = vmul.f32 0.5, %v106_v38  ;;  %v154_v51 = vmul.f32 0.5, %v118_v39 }
  0x99   :  { %352 = vtanh.f32 %v157_v36  ;;  %v347_v43 = vpop.eup %346  ;;  %v181_v44 = vmul.f32 0.5, %v345_v41 }
  0x9a   :  { %354 = vtanh.f32 %v161_v37  ;;  %v349_v45 = vpop.eup %348  ;;  %v185_v46 = vmul.f32 0.5, %v347_v43 }
  0x9b   :  { %v351_v48 = vpop.eup %350  ;;  %v197_v50 = vadd.f32 0.5, %v181_v44  ;;  %v188_v54 = vmul.f32 0.5, %v349_v45  ;;  %356 = vtanh.f32 %v150_v47 }
  0x9c   :  { %v201_v53 = vadd.f32 0.5, %v185_v46  ;;  %v192_v59 = vmul.f32 0.5, %v351_v48  ;;  %358 = vtanh.f32 %v154_v51 }
  0x9d   :  { %v281_v55 = vpack.c.bf16 %v197_v50, %v196_v49  ;;  %v204_v5 = vadd.f32 0.5, %v188_v54 }
  0x9e   :  { %v130_v56 = vpop.f32.mrf.mxu2  ;;  %v142_v57 = vpop.f32.mrf.mxu3  ;;  %v291_v60 = vpack.c.bf16 %v201_v53, %v200_v52  ;;  %v208_v8 = vadd.f32 0.5, %v192_v59 }
  0x9f   :  { %v353_v58 = vpop.eup %352  ;;  %v109_v61 = vpop.f32.mrf.mxu0  ;;  %282 = vst [vmem:[#allocation2] sm:$0xff] %v281_v55   ;;  %v158_v4 = vmul.f32 0.5, %v130_v56  ;;  %v162_v7 = vmul.f32 0.5, %v142_v57 }
  0xa0   :  { %v121_v62 = vpop.f32.mrf.mxu1  ;;  %v355_v63 = vpop.eup %354  ;;  %v189_v0 = vmul.f32 0.5, %v353_v58  ;;  %v151_v1 = vmul.f32 0.5, %v109_v61  ;;  %319 = vst [vmem:[#allocation2 + $0x10] sm:$0xff] %v291_v60  }
  0xa1   :  { %v155_v2 = vmul.f32 0.5, %v121_v62  ;;  %v193_v3 = vmul.f32 0.5, %v355_v63  ;;  %v357_v11 = vpop.eup %356 }
  0xa2   :  { %v205_v6 = vadd.f32 0.5, %v189_v0  ;;  %360 = vtanh.f32 %v151_v1  ;;  %v359_v13 = vpop.eup %358  ;;  %v182_v18 = vmul.f32 0.5, %v357_v11 }
  0xa3   :  { %v209_v9 = vadd.f32 0.5, %v193_v3  ;;  %362 = vtanh.f32 %v155_v2  ;;  %v186_v20 = vmul.f32 0.5, %v359_v13 }
  0xa4   :  { %v301_v10 = vpack.c.bf16 %v205_v6, %v204_v5  ;;  %364 = vtanh.f32 %v158_v4  ;;  %v198_v26 = vadd.f32 0.5, %v182_v18 }
  0xa5   :  { %v311_v12 = vpack.c.bf16 %v209_v9, %v208_v8  ;;  %366 = vtanh.f32 %v162_v7  ;;  %v202_v28 = vadd.f32 0.5, %v186_v20 }
  0xa6   :  { %321 = vst [vmem:[#allocation2 + $0x20] sm:$0xff] %v301_v10   ;;  %v133_v14 = vpop.f32.mrf.mxu2  ;;  %v145_v15 = vpop.f32.mrf.mxu3 }
  0xa7   :  { %323 = vst [vmem:[#allocation2 + $0x30] sm:$0xff] %v311_v12   ;;  %v159_v16 = vmul.f32 0.5, %v133_v14  ;;  %v163_v17 = vmul.f32 0.5, %v145_v15 }
  0xa8   :  { %v361_v19 = vpop.eup %360 }
  0xa9   :  { %368 = vtanh.f32 %v159_v16  ;;  %v363_v21 = vpop.eup %362  ;;  %v183_v22 = vmul.f32 0.5, %v361_v19 }
  0xaa   :  { %370 = vtanh.f32 %v163_v17  ;;  %v365_v23 = vpop.eup %364  ;;  %v187_v24 = vmul.f32 0.5, %v363_v21 }
  0xab   :  { %v367_v25 = vpop.eup %366  ;;  %v199_v27 = vadd.f32 0.5, %v183_v22  ;;  %v190_v30 = vmul.f32 0.5, %v365_v23 }
  0xac   :  { %v203_v29 = vadd.f32 0.5, %v187_v24  ;;  %v194_v33 = vmul.f32 0.5, %v367_v25 }
  0xad   :  { %v286_v31 = vpack.c.bf16 %v199_v27, %v198_v26  ;;  %v206_v38 = vadd.f32 0.5, %v190_v30 }
  0xae   :  { %v296_v34 = vpack.c.bf16 %v203_v29, %v202_v28  ;;  %v210_v40 = vadd.f32 0.5, %v194_v33 }
  0xaf   :  { %v369_v32 = vpop.eup %368  ;;  %318 = vst [vmem:[#allocation2 + $0x8] sm:$0xff] %v286_v31  }
  0xb0   :  { %v371_v35 = vpop.eup %370  ;;  %v191_v36 = vmul.f32 0.5, %v369_v32  ;;  %320 = vst [vmem:[#allocation2 + $0x18] sm:$0xff] %v296_v34  }
  0xb1   :  { %v195_v37 = vmul.f32 0.5, %v371_v35 }
  0xb2   :  { %v207_v39 = vadd.f32 0.5, %v191_v36 }
  0xb3   :  { %v211_v41 = vadd.f32 0.5, %v195_v37 }
  0xb4   :  { %v306_v42 = vpack.c.bf16 %v207_v39, %v206_v38 }
  0xb5   :  { %v316_v43 = vpack.c.bf16 %v211_v41, %v210_v40 }
  0xb6   :  { %322 = vst [vmem:[#allocation2 + $0x28] sm:$0xff] %v306_v42  }
  0xb7   :  { %324 = vst [vmem:[#allocation2 + $0x38] sm:$0xff] %v316_v43  }
  0xb8   :  { %256 = dma.vmem_to_hbm [thread:$0]  %s249_s20, 1024, %s251_s1, [#allocation3], %s399_s23, %s399_s23, %s400_s24  }
  0xb9   :  { %396 = dma.done.wait [#allocation3], 1024  }
  0xba   :  { %397 = vsyncadd [#allocation3], 4294966272 }
  0xbb   :  { %261 = vsyncpa [#allocation3], 1 }

</bundles_post_ra>
